<compile_context>
chip_gen: v7x
topology: tpu7x:2x2x1
jax: 0.10.0
libtpu: 0.0.40
codegen_flags: <defaults>
</compile_context>

<pallas_src>
import jax
import jax.numpy as jnp
from jax.experimental import pallas as pl
from jax.experimental.pallas import tpu as pltpu


def _copy_kernel(x_ref, o_ref):
    # Lane-aligned path: the channel shuffle is expressed entirely via the
    # BlockSpec index maps; the body is a pure VMEM tile copy.
    o_ref[...] = x_ref[...]


def _relayout_kernel(x_ref, o_ref):
    # Relayout path: x_ref is (G, cpg_tile, HW), o_ref is (cpg_tile, G, HW).
    # Swapping the two leading (non-lane) dims is the whole shuffle; the lane
    # dim (HW) is untouched, so this is an in-VMEM sublane relayout.
    o_ref[...] = pltpu.einshape("gch->cgh", x_ref[...])


def _pick_cpg_tile(cpg: int, per_c_bytes: int, other_steps: int) -> int:
    """Channels-per-group moved per grid step.

    The tile must be `cpg` itself or a multiple-of-8 divisor of `cpg` (the
    sublane dim of the input block has to be full-extent or 8-aligned).
    Target ~1-4 MiB blocks (amortize the ~0.35us/step overhead, keep
    double-buffered in+out well under v7x's 64 MiB VMEM) and keep at least 2
    grid steps so both of v7x's TensorCores get work (harmless on v5e/v6e).
    """
    max_block = 4 << 20        # soft cap per block
    min_block = 256 << 10      # don't split below this just for parallelism

    candidates = [cpg] + [t for t in range(8, cpg, 8) if cpg % t == 0]
    fitting = sorted(t for t in candidates if t * per_c_bytes <= max_block)
    if not fitting:            # pathological (huge G*HW): smallest legal tile
        return min(candidates, key=lambda t: t * per_c_bytes)

    tile = fitting[-1]         # fewest grid steps within the VMEM cap
    if other_steps * (cpg // tile) < 2:
        for t in reversed(fitting):
            if cpg // t >= 2 and t * per_c_bytes >= min_block:
                tile = t
                break
    return tile


def channel_shuffle(x: jax.Array, num_groups: int) -> jax.Array:
    """ShuffleNet channel shuffle on an NCHW tensor using a Pallas TPU kernel."""
    B, C, H, W = x.shape
    G = int(num_groups)
    assert C % G == 0, "channels must be divisible by num_groups"
    if G == 1:
        return x  # identity: skip 2*B*C*H*W bytes of pointless HBM traffic

    cpg = C // G
    HW = H * W
    itemsize = jnp.dtype(x.dtype).itemsize
    cost = pl.CostEstimate(
        flops=0, transcendentals=0, bytes_accessed=2 * B * C * HW * itemsize
    )
    x_v = x.reshape(B, G, cpg, HW)  # free view of contiguous NCHW memory

    if HW % 128 == 0:
        # Lane-aligned path: permutation lives in the BlockSpecs; every store
        # lands at a 128-aligned lane offset (g*HW) so it is unmasked.
        cpg_tile = _pick_cpg_tile(cpg, HW * itemsize, B * G)
        n_ct = cpg // cpg_tile
        block_bytes = cpg_tile * HW * itemsize
        vmem_limit = min(max(32 << 20, 4 * block_bytes + (4 << 20)), 96 << 20)

        out = pl.pallas_call(
            _copy_kernel,
            out_shape=jax.ShapeDtypeStruct((B, cpg, G * HW), x.dtype),
            grid_spec=pltpu.PrefetchScalarGridSpec(
                num_scalar_prefetch=0,
                grid=(B, n_ct, G),
                in_specs=[
                    pl.BlockSpec((None, None, cpg_tile, HW),
                                 lambda b, c, g: (b, g, c, 0)),
                ],
                out_specs=pl.BlockSpec((None, cpg_tile, HW),
                                       lambda b, c, g: (b, c, g)),
            ),
            compiler_params=pltpu.CompilerParams(
                dimension_semantics=("parallel", "parallel", "parallel"),
                vmem_limit_bytes=vmem_limit,
            ),
            cost_estimate=cost,
        )(x_v)
        # (B, cpg, G*HW) is contiguous == (B, cpg*G, H, W): free view back.
        return out.reshape(B, C, H, W)

    # Relayout path (HW not a multiple of 128, e.g. 7x7/14x14/28x28):
    # contiguous input and output HBM DMAs, shuffle done as an in-VMEM
    # sublane relayout, one coarse grid step per (batch, channel-chunk).
    cpg_tile = _pick_cpg_tile(cpg, G * HW * itemsize, B)
    n_ct = cpg // cpg_tile
    block_bytes = G * cpg_tile * HW * itemsize
    vmem_limit = min(max(32 << 20, 4 * block_bytes + (4 << 20)), 96 << 20)

    out = pl.pallas_call(
        _relayout_kernel,
        out_shape=jax.ShapeDtypeStruct((B, cpg, G, HW), x.dtype),
        grid_spec=pltpu.PrefetchScalarGridSpec(
            num_scalar_prefetch=0,
            grid=(B, n_ct),
            in_specs=[
                pl.BlockSpec((None, G, cpg_tile, HW),
                             lambda b, c: (b, 0, c, 0)),
            ],
            out_specs=pl.BlockSpec((None, cpg_tile, G, HW),
                                   lambda b, c: (b, c, 0, 0)),
        ),
        compiler_params=pltpu.CompilerParams(
            dimension_semantics=("parallel", "parallel"),
            vmem_limit_bytes=vmem_limit,
        ),
        cost_estimate=cost,
    )(x_v)
    # (B, cpg, G, HW) is contiguous == (B, cpg*G, H, W): free view back.
    return out.reshape(B, C, H, W)


def channel_shuffle_ref(x: jax.Array, num_groups: int) -> jax.Array:
    """Pure-JAX reference mirroring the PyTorch forward exactly."""
    B, C, H, W = x.shape
    cpg = C // num_groups
    y = x.reshape(B, num_groups, cpg, H, W)
    y = jnp.swapaxes(y, 1, 2)
    return y.reshape(B, -1, H, W)


if __name__ == "__main__":
    key = jax.random.PRNGKey(0)

    # 1) Lane-aligned path (HW % 128 == 0), the spec's small example shape.
    B, C, H, W = 2, 4, 16, 16
    num_groups = 2
    x = jax.random.normal(key, (B, C, H, W), dtype=jnp.float32)
    out = jax.block_until_ready(channel_shuffle(x, num_groups))
    ref = channel_shuffle_ref(x, num_groups)
    assert out.shape == (B, C, H, W)
    assert jnp.array_equal(out, ref), "aligned-path channel shuffle mismatch"

    # 2) Relayout path (HW % 128 != 0), typical ShuffleNet-like spatial size.
    B2, C2, H2, W2 = 2, 8, 7, 7
    g2 = 4
    key2 = jax.random.PRNGKey(0)
    x2 = jax.random.normal(key2, (B2, C2, H2, W2), dtype=jnp.float32)
    out2 = jax.block_until_ready(channel_shuffle(x2, g2))
    ref2 = channel_shuffle_ref(x2, g2)
    assert out2.shape == (B2, C2, H2, W2)
    assert jnp.array_equal(out2, ref2), "relayout-path channel shuffle mismatch"

    # 3) G == 1 identity short-circuit.
    out3 = jax.block_until_ready(channel_shuffle(x, 1))
    assert jnp.array_equal(out3, x)

    print("KERNEL_OK")
</pallas_src>

<mosaic_0001>
module attributes {stable_mosaic.version = 11 : i64} {
  func.func @_copy_kernel(%arg0: i32, %arg1: i32, %arg2: i32, %arg3: memref<1x1x2x256xf32, #tpu.memory_space<vmem>>, %arg4: memref<1x2x256xf32, #tpu.memory_space<vmem>>) attributes {dimension_semantics = [#tpu.dimension_semantics<parallel>, #tpu.dimension_semantics<parallel>, #tpu.dimension_semantics<parallel>], iteration_bounds = array<i64: 2, 1, 2>, scalar_prefetch = 0 : i64, scratch_operands = 0 : i64, tpu.core_type = #tpu.core_type<tc>, window_params = [{transform_indices = @transform_0, window_bounds = array<i64: 1, 1, 2, 256>}, {transform_indices = @transform_1, window_bounds = array<i64: 1, 2, 256>}]} {
    %c0 = arith.constant 0 : index
    %c0_0 = arith.constant 0 : index
    %c0_1 = arith.constant 0 : index
    %c0_2 = arith.constant 0 : index
    %0 = vector.load %arg3[%c0, %c0_0, %c0_1, %c0_2] : memref<1x1x2x256xf32, #tpu.memory_space<vmem>>, vector<1x1x2x256xf32>
    %1 = vector.shape_cast %0 : vector<1x1x2x256xf32> to vector<2x256xf32>
    %c0_3 = arith.constant 0 : index
    %c0_4 = arith.constant 0 : index
    %c0_5 = arith.constant 0 : index
    %2 = vector.load %arg4[%c0_3, %c0_4, %c0_5] : memref<1x2x256xf32, #tpu.memory_space<vmem>>, vector<1x2x256xf32>
    %3 = vector.shape_cast %2 : vector<1x2x256xf32> to vector<2x256xf32>
    %4 = vector.shape_cast %1 : vector<2x256xf32> to vector<1x2x256xf32>
    tpu.vector_store %arg4[%c0_3, %c0_4, %c0_5], %4 {strides = array<i32>} : memref<1x2x256xf32, #tpu.memory_space<vmem>>, vector<1x2x256xf32>,
    return
  }
  func.func @transform_0(%arg0: i32, %arg1: i32, %arg2: i32) -> (i32, i32, i32, i32) {
    %c0_i32 = arith.constant 0 : i32
    %c0_i32_0 = arith.constant 0 : i32
    return %arg0, %arg2, %arg1, %c0_i32 : i32, i32, i32, i32
  }
  func.func @transform_1(%arg0: i32, %arg1: i32, %arg2: i32) -> (i32, i32, i32) {
    %c0_i32 = arith.constant 0 : i32
    return %arg0, %arg1, %arg2 : i32, i32, i32
  }
}

</mosaic_0001>

<bundles_post_ra>
// kernel: tpu_custom_call.1
= control target key start
LH: loop header
LB: loop body
LE: loop exit
PB: predicated region body
PF: predicated region fallthrough
CT: control target
= control target key end

     0   :  { %6 = vsyncpa [#allocation3], 0  ;;  %s711_s0 = inlined_call_operand.hbm [shape: f32[2,2,2,256], index: 0, kind: input, shape index: {}]   ;;  %s712_s1 = inlined_call_operand.hbm [shape: f32[2,2,512], index: 1, kind: output, shape index: {}]  }
   0x1   :  { %8 = vsyncpa [#allocation3 + $0x1], 0 }
   0x2   :  { %9 = vsyncpa [#allocation4], 0 }
   0x3   :  { %11 = vsyncpa [#allocation4 + $0x1], 0  ;;  %s517_s6 = smov 0   ;;  %s519_s7 = smov 0  }
   0x4   :  { %s521_s8 = smov 0   ;;  %s523_s9 = smov 0  }
   0x5   :  { %s525_s10 = smov 0   ;;  %s527_s11 = smov 0  }
   0x6   :  { %s529_s12 = smov 0   ;;  %s531_s13 = smov 0  }
   0x7 LB: > { %s280_s14 = sadd.s32 4294967295, %s503_s13   ;;  %s281_s15 = sadd.s32 4294967294, %s503_s13   ;;  %s503_s13 = sphi %s531_s13, %s17_s13   ;;  %s499_s12 = sphi %s529_s12, %s729_s12   ;;  %s495_s11 = sphi %s527_s11, %s728_s11   ;;  %s491_s10 = sphi %s525_s10, %s727_s10   ;;  %s487_s9 = sphi %s523_s9, %s726_s9   ;;  %s483_s8 = sphi %s521_s8, %s725_s8   ;;  %s479_s7 = sphi %s519_s7, %s724_s7   ;;  %s475_s6 = sphi %s517_s6, %s723_s6  }
   0x8   : > { %s29_s16 = sadd.s32 1, %s495_s11  ;;  %s36_s17 = sadd.s32 1, %s499_s12 }
   0x9   : > { %p30_p0 = scmp.ge.s32.totalorder %s29_s16, 2  ;;  %s47_s18 = sadd.s32 1, %s483_s8 }
   0xa   : > { %p54_p1 = scmp.ne.s32.totalorder %s483_s8, %s479_s7  ;;  %p55_p2 = scmp.eq.s32.totalorder %s503_s13, 0 }
   0xb   : > { %s731_s16 = smov (%p30_p0, %s29_s16), 0  ;;  %s733_s17 = smov (!%p30_p0, %s36_s17), %s499_s12 }
   0xc   : > { %s41_s19 = ssub.s32 %s495_s11, %s731_s16  ;;  %p570_p3 = por %p55_p2, %p54_p1 }
   0xd   : > { %p38_p4 = scmp.ge.s32.totalorder %s733_s17, 2  ;;  %p60_p5 = scmp.ne.s32.totalorder %s479_s7, %s475_s6 }
   0xe   : > { %p61_p6 = scmp.eq.s32.totalorder %s280_s14, 0  ;;  %p88_p7 = scmp.eq.s32.totalorder %s280_s14, 3 }
   0xf   : > { %s735_s17 = smov (%p38_p4, %s733_s17), 0  ;;  %p94_p10 = scmp.eq.s32.totalorder %s281_s15, 3 }
  0x10   : > { %p578_p8 = por %p61_p6, %p60_p5  ;;  %p582_p9 = por %p88_p7, %p54_p1 }
  0x11   : > { %s40_s23 = ssub.s32 %s499_s12, %s735_s17  ;;  %p588_p12 = por %p94_p10, %p60_p5 }
  0x12   : > { %s716_s22 = scalar_select %p582_p9, 1, 0 }
  0x13   : > { %s42_s24 = sor.u32 %s41_s19, %s40_s23  ;;  %p309_p13 = scmp.lt.s32.totalorder %s503_s13, 4 }
  0x14   : > { %p45_p11 = scmp.eq.s32.totalorder %s42_s24, 0  ;;  %s114_s26 = sand.u32 1, %s483_s8  }
  0x15   : > { %s717_s25 = scalar_select %p588_p12, 1, 0 }
  0x16   : > { %s595_s27 = scalar_select %p45_p11, %s483_s8, %s47_s18  }
  0x17   : > { %s284_s28 = sshll.u32 %s114_s26, 2  ;;  %s285_s29 = sshll.u32 %s495_s11, 1 }
  0x18   : > { %s286_s30 = sshll.u32 %s499_s12, 2  ;;  %s118_s2 = scalar_lea.vmem [#allocation2], %s284_s28 }
  0x19   : > { %s130_s3 = sshll.u32 %s118_s2, 4  ;;  %s126_s4 = sadd.s32 %s286_s30, %s285_s29  ;;  %s599_s3 = int_to_ptr.vmem [resolvable:$true] %s130_s3 }
  0x1a   : > { %s287_s5 = sshll.u32 %s126_s4, 5  ;;  %p603_p0 = pnand %p309_p13, %p570_p3 }
  0x1b   : > { %s610_s18 = scalar_lea.hbm %s711_s0, %s287_s5  ;;  %s115_s23 = scalar_lea.sflag [#allocation3], %s114_s26 }
  0x1c   : > { %s375_s24 = scalar_lea.hbm %s610_s18, 64  ;;  %p377_p3 = pneg %p603_p0 }
  0x1d   : > { %p376_p4 = scmp.ne.s32.totalorder %s610_s18, %s375_s24  ;;  %s380_s29 = scalar_lea.hbm %s711_s0, 256 }
  0x1e   : > { %p381_p7 = scmp.lt.u32.totalorder %s610_s18, %s711_s0  ;;  %p382_p10 = scmp.lt.u32.totalorder %s380_s29, %s375_s24 }
  0x1f   : > { %p378_p5 = pnand %p377_p3, %p376_p4  ;;  %p384_p13 = scmp.lt.u32.totalorder %s375_s24, %s610_s18 }
  0x20   : > { %p383_p11 = por %p382_p10, %p381_p7 }
  0x21   : > { %p379_p6 = pneg %p378_p5 }
  0x22   : > { %p385_p1 = por %p384_p13, %p383_p11 }
  0x24   : > { %p386_p2 = pnand %p385_p1, %p379_p6 }
  0x26   : > { %389 = shalt.err (!%p386_p2)
}
  0x27   : > { %s390_s26 = scalar_lea.vmem %s599_s3, 64  ;;  %s505_s4 = smov [#allocation2]  }
  0x28   : > { %p391_p4 = scmp.ne.s32.totalorder %s599_s3, %s390_s26  ;;  %s395_s5 = sshll.u32 %s505_s4, 4  ;;  %s396_s5 = int_to_ptr.vmem [resolvable:$false] %s395_s5 }
  0x29   : > { %s397_s15 = scalar_lea.vmem %s396_s5, 128  ;;  %p398_p9 = scmp.lt.s32.totalorder %s599_s3, %s396_s5 }
  0x2a   : > { %p393_p5 = pnand %p391_p4, %p377_p3  ;;  %p399_p7 = scmp.lt.s32.totalorder %s397_s15, %s390_s26 }
  0x2c   : > { %p394_p12 = pneg %p393_p5  ;;  %p400_p10 = por %p399_p7, %p398_p9 }
  0x2e   : > { %p401_p11 = pnand %p400_p10, %p394_p12 }
  0x30   : > { %404 = shalt.err (!%p401_p11)
}
  0x31   : > { %304 = dma.hbm_to_vmem [thread:$0]  (!%p603_p0), %s610_s18, 64, %s599_s3, %s115_s23  }
  0x32   : > { %p719_p1 = scmp.lt.s32.totalorder %s503_s13, 5  ;;  %p720_p2 = scmp.ge.s32.totalorder %s503_s13, 1 }
  0x34   : > { %p136_p3 = pnand %p720_p2, %p719_p1 }
  0x35   : > { %s644_s19 = sand.u32 (!%p136_p3), 1, %s479_s7  }
  0x36   : > { %139 = sbr.rel (%p136_p3) target bundleno = 89 (0x59), region = 24  ;;  %s289_s24 = sshll.u32 (!%p136_p3), %s644_s19, 2 }
  0x37   : > { %s142_s20 = scalar_lea.sflag (!%p136_p3), [#allocation3], %s644_s19  ;;  %s145_s28 = scalar_lea.vmem (!%p136_p3), [#allocation2], %s289_s24 }
  0x3d   : > { %466 = dma.done.wait (%p578_p8), %s142_s20, 64  }
  0x3e   : > { %468 = vsyncadd (%p578_p8), %s142_s20, 4294967232  ;;  %s292_s3 = sshll.u32 %s487_s9, 1  ;;  %s293_s14 = sshll.u32 %s491_s10, 2  ;;  %v165_v0 = vld [vmem:[%s145_s28] sm:$0xf] }
  0x3f   : > { %s163_s18 = scalar_lea.vmem [#allocation5], %s289_s24  ;;  %s182_s29 = sadd.s32 %s293_s14, %s292_s3 }
  0x40   : > { %s186_s23 = sshll.u32 %s163_s18, 4  ;;  %s294_s30 = sshll.u32 %s182_s29, 5  ;;  %166 = vst [vmem:[%s163_s18] sm:$0xf] %v165_v0  ;;  %s654_s23 = int_to_ptr.vmem [resolvable:$true] %s186_s23 }
  0x41   : > { %s659_s21 = scalar_lea.hbm %s712_s1, %s294_s30  ;;  %s168_s4 = scalar_lea.sflag [#allocation4], %s644_s19 }
  0x42   : > { %s405_s5 = scalar_lea.vmem %s654_s23, 64  ;;  %p721_p9 = scmp.ne.s32.totalorder %s716_s22, 0 }
  0x43   : > { %p406_p8 = scmp.ne.s32.totalorder %s654_s23, %s405_s5  ;;  %s506_s9 = smov [#allocation5]  }
  0x44   : > { %s409_s10 = sshll.u32 %s506_s9, 4  ;;  %s410_s10 = int_to_ptr.vmem [resolvable:$false] %s409_s10 }
  0x45   : > { %p407_p12 = pnand %p406_p8, %p721_p9  ;;  %s411_s15 = scalar_lea.vmem %s410_s10, 128 }
  0x46   : > { %p412_p6 = scmp.lt.s32.totalorder %s654_s23, %s410_s10  ;;  %p413_p13 = scmp.lt.s32.totalorder %s411_s15, %s405_s5 }
  0x47   : > { %p408_p0 = pneg %p407_p12 }
  0x48   : > { %p414_p4 = por %p413_p13, %p412_p6 }
  0x4a   : > { %p415_p5 = pnand %p414_p4, %p408_p0 }
  0x4c   : > { %418 = shalt.err (!%p415_p5)
}
  0x4d   : > { %s419_s19 = scalar_lea.hbm %s659_s21, 64  ;;  %s423_s28 = scalar_lea.hbm %s712_s1, 256 }
  0x4e   : > { %p420_p7 = scmp.ne.s32.totalorder %s659_s21, %s419_s19  ;;  %p424_p1 = scmp.lt.u32.totalorder %s659_s21, %s712_s1 }
  0x4f   : > { %p425_p2 = scmp.lt.u32.totalorder %s423_s28, %s419_s19  ;;  %p427_p8 = scmp.lt.u32.totalorder %s419_s19, %s659_s21 }
  0x50   : > { %p421_p10 = pnand %p420_p7, %p721_p9 }
  0x51   : > { %p426_p3 = por %p425_p2, %p424_p1 }
  0x52   : > { %p422_p11 = pneg %p421_p10 }
  0x53   : > { %p428_p12 = por %p427_p8, %p426_p3 }
  0x55   : > { %p429_p0 = pnand %p428_p12, %p422_p11 }
  0x57   : > { %432 = shalt.err (!%p429_p0)
}
  0x58   : > { %299 = dma.vmem_to_hbm [thread:$0]  (%p721_p9), %s654_s23, 64, %s659_s21, %s168_s4  }
  0x59 PF: > { %p310_p6 = scmp.ge.s32.totalorder %s503_s13, 2  ;;  %s198_s18 = sand.u32 1, %s475_s6  }
  0x5a   : > { %p722_p13 = scmp.ne.s32.totalorder %s717_s25, 0  ;;  %s199_s29 = scalar_lea.sflag [#allocation4], %s198_s18 }
  0x5c   : > { %p306_p4 = pnand %p310_p6, %p722_p13 }
  0x5e   : > { %470 = dma.done.wait (!%p306_p4), %s199_s29, 64  }
  0x5f   : > { %472 = vsyncadd (!%p306_p4), %s199_s29, 4294967232  ;;  %s17_s13 = sadd.s32 1, %s503_s13   ;;  %s723_s6 = smov %s479_s7 }
  0x60   : > { %p14_p5 = scmp.ge.s32.totalorder %s17_s13, 6   ;;  %s724_s7 = smov %s483_s8 }
  0x61   : > { %s725_s8 = smov %s595_s27  ;;  %s726_s9 = smov %s495_s11 }
  0x62   : > { %s727_s10 = smov %s499_s12  ;;  %s728_s11 = smov %s731_s16 }
  0x63   : > { %s729_s12 = smov %s735_s17  ;;  %16 = sbr.rel (!%p14_p5) target bundleno = 7 (0x7), region = 69 }
  0x6a   :  { %204 = vsyncpa [#allocation3], 1 }
  0x6b   :  { %206 = vsyncpa [#allocation3 + $0x1], 1 }
  0x6c   :  { %207 = vsyncpa [#allocation4], 1 }
  0x6d   :  { %209 = vsyncpa [#allocation4 + $0x1], 1 }

</bundles_post_ra>
